<compile_context>
chip_gen: v7x
topology: tpu7x:2x2x1
jax: 0.10.0
libtpu: 0.0.40
codegen_flags: <defaults>
</compile_context>

<pallas_src>
import functools
import math

import jax
import jax.numpy as jnp
from jax.experimental import pallas as pl
from jax.experimental.pallas import tpu as pltpu


def _default_vmem_limit():
    """Generation-aware scoped-VMEM budget: ~85% of physical VMEM leaves
    headroom for compiler scratch + double buffers (v7x ~54 of 64 MiB,
    v5e/v6e ~108 of 128 MiB)."""
    try:
        cap = int(pltpu.get_tpu_info().vmem_capacity_bytes)
    except Exception:
        cap = 64 * 1024 * 1024          # conservative fallback, fits every gen
    return int(cap * 0.85)


_VMEM_LIMIT = _default_vmem_limit()


def _pick_tile(dim, want, aligns):
    """Largest tile <= want that divides `dim` and is a multiple of one of
    `aligns` (tried in order, e.g. (256, 128) to prefer MXU-wide tiles on
    v6e/v7x); falls back to the full dim (always a legal Pallas block)."""
    want = min(want, dim)
    for align in aligns:
        t = (want // align) * align
        while t >= align:
            if dim % t == 0:
                return t
            t -= align
    return dim


# ----------------------------------------------------------------------------
# Pallas kernels
# ----------------------------------------------------------------------------

def _matmul_kernel(x_ref, w_ref, o_ref, acc_ref, *, activation, trans_b, scale):
    @pl.when(pl.program_id(2) == 0)
    def _init():
        acc_ref[...] = jnp.zeros_like(acc_ref)

    if trans_b:
        # w tile is (tn, tk): contract last dims of both operands (no k.T /
        # no pre-transposed weight copy in HBM).
        # TODO(synk): on v5e benchmark this against a one-time pre-transposed
        # emb.T HBM copy fed through the (K, N) path (XLU transpose feed can
        # become the binding slot on the smaller MXU).
        acc_ref[...] += jax.lax.dot_general(
            x_ref[...], w_ref[...],
            dimension_numbers=(((1,), (1,)), ((), ())),
            preferred_element_type=jnp.float32)
    else:
        acc_ref[...] += jnp.dot(x_ref[...], w_ref[...],
                                preferred_element_type=jnp.float32)

    @pl.when(pl.program_id(2) == pl.num_programs(2) - 1)
    def _finalize():
        acc = acc_ref[...]
        if scale is not None:
            acc = acc * jnp.float32(scale)
        if activation == "relu":
            acc = jnp.maximum(acc, 0.0)
        o_ref[...] = acc.astype(o_ref.dtype)


def linear_pallas(x, w, activation=None, trans_b=False, scale=None,
                  out_dtype=jnp.bfloat16, tm=512, tn=512, tk=1024):
    """x: (M, K); w: (K, N) or (N, K) if trans_b.  Tiled, pipelined,
    bf16 operands + f32 VMEM accumulator.  Large default tiles amortise the
    per-grid-step overhead; 256-multiple N/K tiles feed the 256-wide MXU."""
    M, K = x.shape
    if trans_b:
        N, Kw = w.shape
    else:
        Kw, N = w.shape
    assert K == Kw
    tm = _pick_tile(M, tm, (16, 8))          # bf16 packs 16 rows per vreg
    tn = _pick_tile(N, tn, (256, 128))
    tk = _pick_tile(K, tk, (256, 128))
    nk = K // tk
    grid = (M // tm, N // tn, nk)
    # Skinny-M matmuls with many K steps (decode-time QKV/FFN/vocab): deepen
    # the weight stream so the dominant HBM operand stays hidden.
    w_kwargs = ({"pipeline_mode": pl.Buffered(3)}
                if (M <= 1024 and nk >= 3) else {})
    if trans_b:
        w_spec = pl.BlockSpec((tn, tk), lambda i, j, k: (j, k), **w_kwargs)
    else:
        w_spec = pl.BlockSpec((tk, tn), lambda i, j, k: (k, j), **w_kwargs)
    return pl.pallas_call(
        functools.partial(_matmul_kernel, activation=activation,
                          trans_b=trans_b, scale=scale),
        out_shape=jax.ShapeDtypeStruct((M, N), out_dtype),
        grid=grid,
        in_specs=[pl.BlockSpec((tm, tk), lambda i, j, k: (i, k)), w_spec],
        out_specs=pl.BlockSpec((tm, tn), lambda i, j, k: (i, j)),
        scratch_shapes=[pltpu.VMEM((tm, tn), jnp.float32)],
        compiler_params=pltpu.CompilerParams(
            dimension_semantics=("parallel", "parallel", "arbitrary"),
            vmem_limit_bytes=_VMEM_LIMIT),
    )(x, w)


def _rmsnorm_kernel(x_ref, w_ref, o_ref, *, eps):
    x = x_ref[...].astype(jnp.float32)
    var = jnp.mean(x * x, axis=-1, keepdims=True)
    y = x * jax.lax.rsqrt(var + eps) * w_ref[...].astype(jnp.float32)
    o_ref[...] = y.astype(o_ref.dtype)


def rmsnorm_pallas(x2d, w, eps=1e-6, out_dtype=jnp.bfloat16, tm=1024):
    """T5LayerNorm: no mean subtraction, no bias.  Mem-bound, so large row
    tiles (fewer grid steps); parallel grid for megacore splitting."""
    M, D = x2d.shape
    tm = _pick_tile(M, tm, (16, 8))
    w2 = w.reshape(1, D)
    return pl.pallas_call(
        functools.partial(_rmsnorm_kernel, eps=eps),
        out_shape=jax.ShapeDtypeStruct((M, D), out_dtype),
        grid=(M // tm,),
        in_specs=[pl.BlockSpec((tm, D), lambda i: (i, 0)),
                  pl.BlockSpec((1, D), lambda i: (0, 0))],
        out_specs=pl.BlockSpec((tm, D), lambda i: (i, 0)),
        compiler_params=pltpu.CompilerParams(
            dimension_semantics=("parallel",),
            vmem_limit_bytes=_VMEM_LIMIT),
    )(x2d, w2)


def _flash_attn_kernel(q_ref, k_ref, v_ref, bias_ref, mask_ref, o_ref,
                       m_ref, l_ref, acc_ref):
    # One grid step = one (batch, head, q-tile, kv-tile).  Online softmax with
    # f32 running max / denom / accumulator held in VMEM scratch; kv is the
    # innermost ("arbitrary") axis so the carry is correct per (b, h, qi).
    kv_i = pl.program_id(3)

    @pl.when(kv_i == 0)
    def _init():
        m_ref[...] = jnp.full_like(m_ref, -jnp.inf)
        l_ref[...] = jnp.zeros_like(l_ref)
        acc_ref[...] = jnp.zeros_like(acc_ref)

    # T5 does NOT scale scores by 1/sqrt(d_head).  Contract the head dims of
    # q and k directly (no in-kernel k.T).
    s = jax.lax.dot_general(q_ref[...], k_ref[...],
                            dimension_numbers=(((1,), (1,)), ((), ())),
                            preferred_element_type=jnp.float32)
    s = s + bias_ref[...]                                    # (tq, tkv) f32
    s = s + (1.0 - mask_ref[...]) * jnp.float32(-1e9)        # key-pad mask

    m_prev = m_ref[...]
    m_new = jnp.maximum(m_prev, jnp.max(s, axis=-1, keepdims=True))
    alpha = jnp.exp(m_prev - m_new)
    p = jnp.exp(s - m_new)
    l_ref[...] = alpha * l_ref[...] + jnp.sum(p, axis=-1, keepdims=True)
    acc_ref[...] = alpha * acc_ref[...] + jnp.dot(
        p.astype(v_ref.dtype), v_ref[...], preferred_element_type=jnp.float32)
    m_ref[...] = m_new

    @pl.when(kv_i == pl.num_programs(3) - 1)
    def _finalize():
        # Fully-masked rows yield uniform attention (matches HF); such rows
        # must be excluded from the loss via labels == -100.  approx
        # reciprocal runs on the EUP slot (~free); ~1e-3 rel error is below
        # bf16 output precision but will not bit-match a PyTorch reference.
        o_ref[...] = (acc_ref[...] *
                      pl.reciprocal(l_ref[...], approx=True)).astype(o_ref.dtype)


def attention_pallas(q, k, v, bias, mask, *, tq=256, tkv=256):
    """softmax(QK^T + pos_bias + key_mask) V, flash-style.

    q: (B, H, Sq, D) bf16; k/v: (B, H, Sk, D) bf16;
    bias: (H, Sq, Sk) f32 shared across batch (position bias [+ causal]),
          sliced per (head, q-tile, kv-tile) block so only a tiny slab is ever
          resident in VMEM;
    mask: (B, 1, Sk) f32 key-padding mask (1 keep / 0 drop).
    Returns (B, H, Sq, D) bf16.

    Grid (B, H, q-tiles, kv-tiles): B / H / q-tiles are "parallel" (keeps both
    v7x TensorCores fed even at batch 1); the kv axis is the online-softmax
    reduction, bounding VMEM at any sequence length.
    """
    B, H, Sq, Dh = q.shape
    Sk = k.shape[2]
    tq = _pick_tile(Sq, tq, (16, 8))         # sublane dim of q / bias blocks
    tkv = _pick_tile(Sk, tkv, (256, 128))    # lane dim of bias / mask blocks
    grid = (B, H, Sq // tq, Sk // tkv)
    # TODO(synk): a lane-dense (B, Sq, H*D) output plus head-major QKV
    # out_specs would delete the surrounding XLA head transposes, but per-head
    # D-wide column blocks are not 128-lane aligned at these dims; revisit.
    return pl.pallas_call(
        _flash_attn_kernel,
        out_shape=jax.ShapeDtypeStruct((B, H, Sq, Dh), jnp.bfloat16),
        grid=grid,
        in_specs=[
            pl.BlockSpec((pl.Squeezed(), pl.Squeezed(), tq, Dh),
                         lambda b, h, qi, ki: (b, h, qi, 0)),
            pl.BlockSpec((pl.Squeezed(), pl.Squeezed(), tkv, Dh),
                         lambda b, h, qi, ki: (b, h, ki, 0)),
            pl.BlockSpec((pl.Squeezed(), pl.Squeezed(), tkv, Dh),
                         lambda b, h, qi, ki: (b, h, ki, 0)),
            pl.BlockSpec((pl.Squeezed(), tq, tkv),
                         lambda b, h, qi, ki: (h, qi, ki)),
            pl.BlockSpec((pl.Squeezed(), 1, tkv),
                         lambda b, h, qi, ki: (b, 0, ki)),
        ],
        out_specs=pl.BlockSpec((pl.Squeezed(), pl.Squeezed(), tq, Dh),
                               lambda b, h, qi, ki: (b, h, qi, 0)),
        scratch_shapes=[pltpu.VMEM((tq, 1), jnp.float32),
                        pltpu.VMEM((tq, 1), jnp.float32),
                        pltpu.VMEM((tq, Dh), jnp.float32)],
        compiler_params=pltpu.CompilerParams(
            dimension_semantics=("parallel", "parallel", "parallel",
                                 "arbitrary"),
            vmem_limit_bytes=_VMEM_LIMIT),
    )(q, k, v, bias, mask)


# ----------------------------------------------------------------------------
# T5 relative position bias (plain-JAX glue: integer bucket math + gather)
# ----------------------------------------------------------------------------

def _relative_position_bucket(relative_position, bidirectional, num_buckets,
                              max_distance):
    relative_buckets = jnp.zeros_like(relative_position)
    if bidirectional:
        num_buckets = num_buckets // 2
        relative_buckets = relative_buckets + (
            (relative_position > 0).astype(jnp.int32) * num_buckets)
        relative_position = jnp.abs(relative_position)
    else:
        relative_position = -jnp.minimum(relative_position, 0)
    max_exact = num_buckets // 2
    is_small = relative_position < max_exact
    rp_f = jnp.maximum(relative_position, 1).astype(jnp.float32)
    rp_if_large = max_exact + (
        jnp.log(rp_f / max_exact)
        / math.log(max_distance / max_exact)
        * (num_buckets - max_exact)
    ).astype(jnp.int32)
    rp_if_large = jnp.minimum(rp_if_large, num_buckets - 1)
    relative_buckets = relative_buckets + jnp.where(
        is_small, relative_position, rp_if_large)
    return relative_buckets


def compute_position_bias(table, q_len, k_len, bidirectional, num_buckets,
                          max_distance):
    ctx = jnp.arange(q_len, dtype=jnp.int32)[:, None]
    mem = jnp.arange(k_len, dtype=jnp.int32)[None, :]
    rel = mem - ctx
    buckets = _relative_position_bucket(rel, bidirectional, num_buckets,
                                        max_distance)
    values = table[buckets]                    # (q, k, H)
    return jnp.transpose(values, (2, 0, 1))    # (H, q, k) f32, shared over B


# ----------------------------------------------------------------------------
# Model (tiny synthetic T5 config, deterministic init)
# ----------------------------------------------------------------------------

def init_params(key, cfg):
    keys = iter(jax.random.split(key, 128))
    d, h, dk = cfg["d_model"], cfg["num_heads"], cfg["d_kv"]
    dff, v, nb = cfg["d_ff"], cfg["vocab"], cfg["num_buckets"]
    inner = h * dk

    def nrm(shape, scale=0.02):
        return (jax.random.normal(next(keys), shape, dtype=jnp.float32)
                * scale).astype(jnp.bfloat16)

    def self_attn():
        # Fused Q/K/V projection: one matmul instead of three.
        return {"wqkv": nrm((d, 3 * inner)), "wo": nrm((inner, d))}

    def cross_attn():
        # Q from decoder hidden, fused K/V from encoder output.
        return {"wq": nrm((d, inner)), "wkv": nrm((d, 2 * inner)),
                "wo": nrm((inner, d))}

    def enc_layer():
        return {"attn": self_attn(), "ln1": jnp.ones((d,), jnp.float32),
                "ffn": {"wi": nrm((d, dff)), "wo": nrm((dff, d))},
                "ln2": jnp.ones((d,), jnp.float32)}

    def dec_layer():
        return {"self_attn": self_attn(), "ln1": jnp.ones((d,), jnp.float32),
                "cross_attn": cross_attn(), "ln2": jnp.ones((d,), jnp.float32),
                "ffn": {"wi": nrm((d, dff)), "wo": nrm((dff, d))},
                "ln3": jnp.ones((d,), jnp.float32)}

    return {
        "emb": nrm((v, d), scale=1.0),
        "enc_rel_bias": jax.random.normal(next(keys), (nb, h), jnp.float32) * 0.02,
        "dec_rel_bias": jax.random.normal(next(keys), (nb, h), jnp.float32) * 0.02,
        "enc_layers": [enc_layer() for _ in range(cfg["num_layers"])],
        "dec_layers": [dec_layer() for _ in range(cfg["num_layers"])],
        "enc_final_ln": jnp.ones((d,), jnp.float32),
        "dec_final_ln": jnp.ones((d,), jnp.float32),
    }


def _to_heads(x2d, B, S, H, Dh):
    # TODO(synk): replace with head-major matmul out_specs (or head-indexed
    # attention BlockSpecs) to remove this XLA transpose HBM round trip; kept
    # because D-wide column blocks are not 128-lane aligned at these dims.
    return x2d.reshape(B, S, H, Dh).transpose(0, 2, 1, 3)


def _from_heads(x4d, B, S, H, Dh):
    return x4d.transpose(0, 2, 1, 3).reshape(B * S, H * Dh)


def self_attention_block(p, x_n, bias, mask, cfg):
    B, S, d = x_n.shape
    H, Dh = cfg["num_heads"], cfg["d_kv"]
    inner = H * Dh
    qkv = linear_pallas(x_n.reshape(B * S, d), p["wqkv"])      # (B*S, 3*inner)
    q = _to_heads(qkv[:, :inner], B, S, H, Dh)
    k = _to_heads(qkv[:, inner:2 * inner], B, S, H, Dh)
    v = _to_heads(qkv[:, 2 * inner:], B, S, H, Dh)
    o = _from_heads(attention_pallas(q, k, v, bias, mask), B, S, H, Dh)
    return linear_pallas(o, p["wo"]).reshape(B, S, d)


def cross_attention_block(p, x_n, enc_out, bias, mask, cfg):
    B, Sq, d = x_n.shape
    Se = enc_out.shape[1]
    H, Dh = cfg["num_heads"], cfg["d_kv"]
    inner = H * Dh
    q = _to_heads(linear_pallas(x_n.reshape(B * Sq, d), p["wq"]), B, Sq, H, Dh)
    kv = linear_pallas(enc_out.reshape(B * Se, d), p["wkv"])   # (B*Se, 2*inner)
    k = _to_heads(kv[:, :inner], B, Se, H, Dh)
    v = _to_heads(kv[:, inner:], B, Se, H, Dh)
    o = _from_heads(attention_pallas(q, k, v, bias, mask), B, Sq, H, Dh)
    return linear_pallas(o, p["wo"]).reshape(B, Sq, d)


def ffn_block(p, x_n, cfg):
    B, S, d = x_n.shape
    h = linear_pallas(x_n.reshape(B * S, d), p["wi"], activation="relu")
    return linear_pallas(h, p["wo"]).reshape(B, S, d)


def rmsnorm(x, w, cfg):
    B, S, d = x.shape
    return rmsnorm_pallas(x.reshape(B * S, d), w, eps=cfg["eps"]).reshape(B, S, d)


def encoder(params, input_ids, attention_mask, cfg):
    B, S = input_ids.shape
    x = params["emb"][input_ids]                                 # bf16
    pos_bias = compute_position_bias(params["enc_rel_bias"], S, S, True,
                                     cfg["num_buckets"], cfg["max_distance"])
    mask = attention_mask.astype(jnp.float32).reshape(B, 1, S)
    for layer in params["enc_layers"]:
        x_n = rmsnorm(x, layer["ln1"], cfg)
        x = x + self_attention_block(layer["attn"], x_n, pos_bias, mask, cfg)
        x = x + ffn_block(layer["ffn"], rmsnorm(x, layer["ln2"], cfg), cfg)
    return rmsnorm(x, params["enc_final_ln"], cfg)


def decoder(params, dec_ids, dec_mask, enc_out, enc_mask, cfg):
    B, Sd = dec_ids.shape
    Se = enc_out.shape[1]
    H = cfg["num_heads"]
    x = params["emb"][dec_ids]
    pos_bias = compute_position_bias(params["dec_rel_bias"], Sd, Sd, False,
                                     cfg["num_buckets"], cfg["max_distance"])
    causal = jnp.where(jnp.arange(Sd)[:, None] >= jnp.arange(Sd)[None, :],
                       0.0, -1e9).astype(jnp.float32)
    self_bias = pos_bias + causal[None]                # (H, Sd, Sd), shared
    cross_bias = jnp.zeros((H, Sd, Se), jnp.float32)
    self_mask = dec_mask.astype(jnp.float32).reshape(B, 1, Sd)
    cross_mask = enc_mask.astype(jnp.float32).reshape(B, 1, Se)
    for layer in params["dec_layers"]:
        x = x + self_attention_block(layer["self_attn"],
                                     rmsnorm(x, layer["ln1"], cfg),
                                     self_bias, self_mask, cfg)
        x = x + cross_attention_block(layer["cross_attn"],
                                      rmsnorm(x, layer["ln2"], cfg), enc_out,
                                      cross_bias, cross_mask, cfg)
        x = x + ffn_block(layer["ffn"], rmsnorm(x, layer["ln3"], cfg), cfg)
    return rmsnorm(x, params["dec_final_ln"], cfg)


def t5_forward(params, cfg, input_ids, attention_mask=None,
               decoder_input_ids=None, decoder_attention_mask=None,
               labels=None):
    B, Se = input_ids.shape
    if attention_mask is None:
        attention_mask = jnp.ones((B, Se), jnp.float32)
    if decoder_input_ids is None:
        # HF T5 shift-right of labels with pad=0 as decoder_start_token.
        decoder_input_ids = jnp.concatenate(
            [jnp.zeros((B, 1), labels.dtype), labels[:, :-1]], axis=1)
        decoder_input_ids = jnp.where(decoder_input_ids == -100, 0,
                                      decoder_input_ids)
    Sd = decoder_input_ids.shape[1]
    if decoder_attention_mask is None:
        decoder_attention_mask = jnp.ones((B, Sd), jnp.float32)

    enc_out = encoder(params, input_ids, attention_mask, cfg)
    dec_out = decoder(params, decoder_input_ids, decoder_attention_mask,
                      enc_out, attention_mask, cfg)

    # Tied embeddings: project onto vocab with the UNtransposed embedding via
    # the trans_b contraction (no emb.T copy in HBM), vocab axis tiled,
    # d**-0.5 rescale folded into the matmul finalize, f32 logits.
    d = cfg["d_model"]
    logits = linear_pallas(dec_out.reshape(B * Sd, d), params["emb"],
                           trans_b=True, scale=d ** -0.5,
                           out_dtype=jnp.float32).reshape(B, Sd, cfg["vocab"])

    loss = None
    if labels is not None:
        logp = jax.nn.log_softmax(logits, axis=-1)
        valid = (labels != -100)
        safe = jnp.where(valid, labels, 0)
        nll = -jnp.take_along_axis(logp, safe[..., None], axis=-1)[..., 0]
        loss = jnp.sum(nll * valid) / jnp.maximum(jnp.sum(valid), 1)
    return {"loss": loss, "logits": logits,
            "encoder_last_hidden_state": enc_out}


# ----------------------------------------------------------------------------
# Main
# ----------------------------------------------------------------------------

if __name__ == "__main__":
    # TODO(synk): SentencePiece tokenizer + pretrained checkpoint loading have
    # no Pallas equivalent; synthetic tiny config + deterministic init instead.
    cfg = dict(vocab=128, d_model=32, num_heads=4, d_kv=8, d_ff=64,
               num_layers=2, num_buckets=8, max_distance=16, eps=1e-6)

    key = jax.random.PRNGKey(0)
    pkey, ikey, dkey, lkey = jax.random.split(key, 4)
    params = init_params(pkey, cfg)

    B, Se, Sd = 2, 8, 8
    input_ids = jax.random.randint(ikey, (B, Se), 0, cfg["vocab"], dtype=jnp.int32)
    attention_mask = jnp.ones((B, Se), jnp.float32).at[1, 6:].set(0.0)
    decoder_input_ids = jax.random.randint(dkey, (B, Sd), 0, cfg["vocab"],
                                           dtype=jnp.int32)
    decoder_attention_mask = jnp.ones((B, Sd), jnp.float32)
    labels = jax.random.randint(lkey, (B, Sd), 0, cfg["vocab"],
                                dtype=jnp.int32).at[1, 7].set(-100)

    out = t5_forward(params, cfg, input_ids, attention_mask,
                     decoder_input_ids, decoder_attention_mask, labels)
    jax.block_until_ready(out)
    assert out["logits"].shape == (B, Sd, cfg["vocab"])
    assert out["encoder_last_hidden_state"].shape == (B, Se, cfg["d_model"])
    assert jnp.isfinite(out["loss"])
    print("KERNEL_OK")
</pallas_src>

<mosaic_0001>
module attributes {stable_mosaic.version = 11 : i64} {
  func.func @_rmsnorm_kernel(%arg0: i32, %arg1: memref<16x32xbf16, #tpu.memory_space<vmem>>, %arg2: memref<1x32xf32, #tpu.memory_space<vmem>>, %arg3: memref<16x32xbf16, #tpu.memory_space<vmem>>) attributes {dimension_semantics = [#tpu.dimension_semantics<parallel>], iteration_bounds = array<i64: 1>, scalar_prefetch = 0 : i64, scratch_operands = 0 : i64, tpu.core_type = #tpu.core_type<tc>, window_params = [{transform_indices = @transform_0, window_bounds = array<i64: 16, 32>}, {pipeline_mode = #tpu.pipeline_mode<synchronous>, transform_indices = @transform_1, window_bounds = array<i64: 1, 32>}, {transform_indices = @transform_2, window_bounds = array<i64: 16, 32>}]} {
    %c0 = arith.constant 0 : index
    %c0_0 = arith.constant 0 : index
    %0 = vector.load %arg1[%c0, %c0_0] : memref<16x32xbf16, #tpu.memory_space<vmem>>, vector<16x32xbf16>
    %1 = arith.extf %0 : vector<16x32xbf16> to vector<16x32xf32>
    %2 = arith.mulf %1, %1 : vector<16x32xf32>
    %cst = arith.constant dense<0.000000e+00> : vector<16xf32>
    %3 = vector.multi_reduction <add>, %2, %cst [1] : vector<16x32xf32> to vector<16xf32>
    %4 = vector.shape_cast %3 : vector<16xf32> to vector<16x1xf32>
    %cst_1 = arith.constant 3.200000e+01 : f32
    %5 = vector.broadcast %cst_1 : f32 to vector<16x1xf32>
    %6 = arith.divf %4, %5 : vector<16x1xf32>
    %cst_2 = arith.constant 9.99999997E-7 : f32
    %7 = vector.broadcast %cst_2 : f32 to vector<16x1xf32>
    %8 = arith.addf %6, %7 : vector<16x1xf32>
    %9 = math.rsqrt %8 : vector<16x1xf32>
    %10 = vector.broadcast %9 : vector<16x1xf32> to vector<16x32xf32>
    %11 = arith.mulf %1, %10 : vector<16x32xf32>
    %c0_3 = arith.constant 0 : index
    %c0_4 = arith.constant 0 : index
    %12 = vector.load %arg2[%c0_3, %c0_4] : memref<1x32xf32, #tpu.memory_space<vmem>>, vector<1x32xf32>
    %13 = vector.broadcast %12 : vector<1x32xf32> to vector<16x32xf32>
    %14 = arith.mulf %11, %13 : vector<16x32xf32>
    %15 = arith.truncf %14 : vector<16x32xf32> to vector<16x32xbf16>
    %c0_5 = arith.constant 0 : index
    %c0_6 = arith.constant 0 : index
    %16 = vector.load %arg3[%c0_5, %c0_6] : memref<16x32xbf16, #tpu.memory_space<vmem>>, vector<16x32xbf16>
    tpu.vector_store %arg3[%c0_5, %c0_6], %15 {strides = array<i32>} : memref<16x32xbf16, #tpu.memory_space<vmem>>, vector<16x32xbf16>,
    return
  }
  func.func @transform_0(%arg0: i32) -> (i32, i32) {
    %c0_i32 = arith.constant 0 : i32
    %c0_i32_0 = arith.constant 0 : i32
    return %arg0, %c0_i32 : i32, i32
  }
  func.func @transform_1(%arg0: i32) -> (i32, i32) {
    %c0_i32 = arith.constant 0 : i32
    %c0_i32_0 = arith.constant 0 : i32
    %c0_i32_1 = arith.constant 0 : i32
    return %c0_i32, %c0_i32_0 : i32, i32
  }
  func.func @transform_2(%arg0: i32) -> (i32, i32) {
    %c0_i32 = arith.constant 0 : i32
    %c0_i32_0 = arith.constant 0 : i32
    return %arg0, %c0_i32 : i32, i32
  }
}

</mosaic_0001>

<bundles_post_ra>
// kernel: tpu_custom_call.1
= control target key start
LH: loop header
LB: loop body
LE: loop exit
PB: predicated region body
PF: predicated region fallthrough
CT: control target
= control target key end

     0   :  { %7 = vsyncpa [#allocation3], 0  ;;  %s202_s0 = inlined_call_operand.hbm [shape: bf16[16,32], index: 0, kind: input, shape index: {}]   ;;  %s203_s1 = inlined_call_operand.vmem [shape: f32[1,32], index: 1, kind: input, shape index: {}]   ;;  %s204_s2 = inlined_call_operand.hbm [shape: bf16[16,32], index: 2, kind: output, shape index: {}]  }
   0x1   :  { %8 = vsyncpa [#allocation4], 0  ;;  %s150_s9 = smov [#allocation2]   ;;  %s102_s13 = scalar_lea.hbm %s202_s0, 128 }
   0x2   :  { %s14_s10 = sshll.u32 %s150_s9, 4  ;;  %p103_p0 = scmp.ne.s32.totalorder %s202_s0, %s102_s13  ;;  %s15_s10 = int_to_ptr.vmem [resolvable:$true] %s14_s10 }
   0x3   :  { %p106_p1 = scmp.lt.u32.totalorder %s102_s13, %s202_s0 }
   0x5   :  { %p108_p2 = pnand %p106_p1, %p103_p0 }
   0x7   :  { %111 = shalt.err (!%p108_p2)
}
   0x8   :  { %s112_s18 = scalar_lea.vmem %s15_s10, 128  ;;  %p117_p4 = scmp.lt.s32.totalorder %s15_s10, %s15_s10 }
   0x9   :  { %p113_p3 = scmp.ne.s32.totalorder %s15_s10, %s112_s18  ;;  %p118_p5 = scmp.lt.s32.totalorder %s112_s18, %s112_s18 }
   0xb   :  { %p119_p6 = por %p118_p5, %p117_p4 }
   0xd   :  { %p120_p7 = pnand %p119_p6, %p113_p3 }
   0xf   :  { %123 = shalt.err (!%p120_p7)
}
  0x10   :  { %s151_s19 = smov 64   ;;  %s152_s20 = smov 4  }
  0x11   :  { %20 = dma.hbm_to_vmem [thread:$0]  %s202_s0, 128, %s15_s10, [#allocation3], %s151_s19, %s151_s19, %s152_s20  }
  0x12   :  { %146 = dma.done.wait [#allocation3], 128  }
  0x13   :  { %147 = vsyncadd [#allocation3], 4294967168  ;;  %v91_v0 = vld [vmem:[#allocation2] sm:$0xff]   ;;  %vm32_vm0 = vcmask 261120   ;;  %vm65_vm1 = vcmask 257024   ;;  %s153_s24 = smov [#allocation5]  }
  0x14   :  { %v92_v1 = vunpack.c.l.bf16 %v91_v0  ;;  %v93_v2 = vunpack.c.h.bf16 %v91_v0  ;;  %v85_v14 = vld [vmem:[%s203_s1] ss:$0 sm:$0xff]  ;;  %s73_s25 = sshll.u32 %s153_s24, 4  ;;  %s74_s25 = int_to_ptr.vmem [resolvable:$true] %s73_s25 }
  0x15   :  { %s124_s26 = scalar_lea.vmem %s74_s25, 128  ;;  %p129_p9 = scmp.lt.s32.totalorder %s74_s25, %s74_s25 }
  0x16   :  { %v30_v3 = vmul.f32 %v92_v1, %v92_v1  ;;  %v31_v4 = vmul.f32 %v93_v2, %v93_v2  ;;  %p125_p8 = scmp.ne.s32.totalorder %s74_s25, %s124_s26  ;;  %p130_p10 = scmp.lt.s32.totalorder %s124_s26, %s124_s26 }
  0x18   :  { %v33_v5 = vsel %vm32_vm0, %v30_v3, 0.0  ;;  %v36_v6 = vsel %vm32_vm0, %v31_v4, 0.0  ;;  %p131_p11 = por %p130_p10, %p129_p9 }
  0x19   :  { %34 = vadd.xlane.f32.xlu0 %v33_v5 }
  0x1a   :  { %p132_p12 = pnand %p131_p11, %p125_p8 }
  0x1d   :  { %37 = vadd.xlane.f32.xlu0 %v36_v6 }
  0xa6   :  { %v35_v7 = vpop.xlane.xlu0 %34 }
  0xa7   :  { %v40_v8 = vmul.f32 0.03125, %v35_v7 }
  0xa9   :  { %v42_v9 = vadd.f32 1e-06, %v40_v8 }
  0xaa   :  { %v38_v10 = vpop.xlane.xlu0 %37 }
  0xab   :  { %98 = vrsqrt.f32 %v42_v9  ;;  %v41_v11 = vmul.f32 0.03125, %v38_v10 }
  0xad   :  { %v43_v12 = vadd.f32 1e-06, %v41_v11 }
  0xaf   :  { %100 = vrsqrt.f32 %v43_v12 }
  0xb5   :  { %v99_v13 = vpop.eup %98 }
  0xb6   :  { %v46_v15 = vmul.f32 %v99_v13, %v92_v1 }
  0xb8   :  { %v55_v16 = vmul.f32 %v85_v14, %v46_v15 }
  0xb9   :  { %v101_v17 = vpop.eup %100 }
  0xba   :  { %v47_v18 = vmul.f32 %v101_v17, %v93_v2  ;;  %v88_v19 = vpack.c.bf16 %v55_v16, %v55_v16 }
  0xbc   :  { %v56_v20 = vmul.f32 %v85_v14, %v47_v18  ;;  %66 = vst.msk [vmem:[#allocation5] sm:$0xf] %vm65_vm1, %v88_v19 }
  0xbe   :  { %v89_v21 = vpack.c.bf16 %v56_v20, %v56_v20 }
  0xc0   :  { %67 = vst.msk [vmem:[#allocation5 + $0x4] sm:$0xf] %vm65_vm1, %v89_v21 }
  0xc1   :  { %135 = shalt.err (!%p132_p12)
}
  0xc2   :  { %s136_s28 = scalar_lea.hbm %s204_s2, 128 }
  0xc3   :  { %p137_p13 = scmp.ne.s32.totalorder %s204_s2, %s136_s28  ;;  %p140_p0 = scmp.lt.u32.totalorder %s136_s28, %s204_s2 }
  0xc5   :  { %p142_p1 = pnand %p140_p0, %p137_p13 }
  0xc7   :  { %145 = shalt.err (!%p142_p1)
}
  0xc8   :  { %79 = dma.vmem_to_hbm [thread:$0]  %s74_s25, 128, %s204_s2, [#allocation4], %s151_s19, %s151_s19, %s152_s20  }
  0xc9   :  { %148 = dma.done.wait [#allocation4], 128  }
  0xca   :  { %149 = vsyncadd [#allocation4], 4294967168 }
  0xcb   :  { %83 = vsyncpa [#allocation3], 1 }
  0xcc   :  { %84 = vsyncpa [#allocation4], 1 }

</bundles_post_ra>
